<compile_context>
chip_gen: v6e
topology: v6e:2x2x1
jax: 0.10.0
libtpu: 0.0.40
codegen_flags: <defaults>
</compile_context>

<pallas_src>
import jax
import jax.numpy as jnp
from jax import lax
from jax.experimental import pallas as pl
from jax.experimental.pallas import tpu as pltpu


def _mixer_cell_kernel(w_ref, b_ref, x2_ref, x1_ref, o_ref):
    # w_ref:  (C1, C2)     b_ref: (C1, 1)
    # x2_ref: (C2, TL)     x1_ref: (C1, TL)     o_ref: (C1, TL)
    # 1x1 conv == matmul contracting over C2:  y[o, l] = sum_c w[o, c] * x2[c, l]
    y = lax.dot_general(
        w_ref[...], x2_ref[...],
        dimension_numbers=(((1,), (0,)), ((), ())),
        preferred_element_type=jnp.float32,
    )                                                                # (C1, TL)
    o_ref[...] = (x1_ref[...].astype(jnp.float32) + y + b_ref[...]).astype(o_ref.dtype)


def mixer_cell_encoder(x1, x2, v, g, b, *, tl=None):
    """x1: (N, C1, H, W)  x2: (N, C2, H, W)  -> (N, C1, H, W)."""
    N, C1, H, W = x1.shape
    _, C2, _, _ = x2.shape
    HW = H * W

    # Weight-norm hoisted into the wrapper (recomputing it per grid step would
    # be wasted work: the grid is a sequential loop on one TensorCore).
    # PyTorch weight_norm default dim=0: per-output-channel L2 over the rest.
    inv_norm = lax.rsqrt(jnp.sum(v.astype(jnp.float32) ** 2, axis=1, keepdims=True))
    w = (g.reshape(C1, 1).astype(jnp.float32) * v.astype(jnp.float32) * inv_norm)
    w = w.astype(x2.dtype)                                           # (C1, C2)
    b2 = b.reshape(C1, 1).astype(jnp.float32)                        # (C1, 1)

    # NCHW-native: flatten only the spatial dims (free reshape, no transpose).
    x1r = x1.reshape(N, C1, HW)
    x2r = x2.reshape(N, C2, HW)

    # Lane tile: large multiple of 128 so stores are full-width vst and each
    # grid step moves a big contiguous slab.  Even at tl=8192 the double-
    # buffered tiles are < ~1 MiB total, far under v5e's 16 MiB scoped VMEM
    # and v7x's 32 MiB default, so no vmem_limit_bytes bump is needed.
    if tl is None:
        if HW <= 128:
            tl = HW                       # full extent (allowed by tiling rules)
        else:
            tl = min(HW, 8192)
            tl = (tl // 128) * 128        # multiple of 128; tail block is padded
    grid = (N, pl.cdiv(HW, tl))           # no divisibility requirement on HW

    itemsize = x1.dtype.itemsize
    cost = pl.CostEstimate(
        flops=2 * N * HW * C1 * C2,
        transcendentals=0,
        bytes_accessed=itemsize * N * HW * (C2 + 2 * C1),
    )

    out = pl.pallas_call(
        _mixer_cell_kernel,
        out_shape=jax.ShapeDtypeStruct((N, C1, HW), x1.dtype),
        grid_spec=pltpu.PrefetchScalarGridSpec(
            num_scalar_prefetch=0,
            grid=grid,
            in_specs=[
                pl.BlockSpec((C1, C2), lambda n, j: (0, 0)),                     # w (full)
                pl.BlockSpec((C1, 1), lambda n, j: (0, 0)),                      # bias (full)
                pl.BlockSpec((pl.Squeezed(), C2, tl), lambda n, j: (n, 0, j)),   # x2 tile
                pl.BlockSpec((pl.Squeezed(), C1, tl), lambda n, j: (n, 0, j)),   # x1 tile
            ],
            out_specs=pl.BlockSpec((pl.Squeezed(), C1, tl), lambda n, j: (n, 0, j)),
        ),
        compiler_params=pltpu.CompilerParams(
            dimension_semantics=("parallel", "parallel"),
        ),
        cost_estimate=cost,
    )(w, b2, x2r, x1r)

    return out.reshape(N, C1, H, W)


def _reference(x1, x2, v, g, b):
    # pure-JAX reference of the PyTorch forward
    norm = jnp.sqrt(jnp.sum(v * v, axis=1, keepdims=True))
    w = g.reshape(-1, 1) * v / norm                                  # (C1, C2)
    y = jnp.einsum("nchw,oc->nohw", x2, w) + b.reshape(1, -1, 1, 1)
    return x1 + y


if __name__ == "__main__":
    # small shapes consistent with the module
    N, C1, C2, Hs, Ws = 2, 4, 8, 16, 16

    key = jax.random.PRNGKey(0)
    k1, k2, kv, kg, kb = jax.random.split(key, 5)

    x1 = jax.random.normal(k1, (N, C1, Hs, Ws), dtype=jnp.float32)
    x2 = jax.random.normal(k2, (N, C2, Hs, Ws), dtype=jnp.float32)

    # weight_norm(Conv2d(C2 -> C1, k=1)) parameters:
    #   v: (C1, C2) direction, g: (C1,) magnitude, b: (C1,) bias
    v = jax.random.normal(kv, (C1, C2), dtype=jnp.float32) * 0.2
    g = jax.random.uniform(kg, (C1,), dtype=jnp.float32, minval=0.5, maxval=1.5)
    b = jax.random.normal(kb, (C1,), dtype=jnp.float32) * 0.1

    out = mixer_cell_encoder(x1, x2, v, g, b)
    out = jax.block_until_ready(out)

    ref = _reference(x1, x2, v, g, b)
    assert out.shape == (N, C1, Hs, Ws)
    assert jnp.allclose(out, ref, atol=1e-5, rtol=1e-5), "mismatch vs reference"

    print("KERNEL_OK")
</pallas_src>

<mosaic_0001>
module attributes {stable_mosaic.version = 11 : i64} {
  func.func @_mixer_cell_kernel(%arg0: i32, %arg1: i32, %arg2: memref<4x8xf32, #tpu.memory_space<vmem>>, %arg3: memref<4x1xf32, #tpu.memory_space<vmem>>, %arg4: memref<1x8x256xf32, #tpu.memory_space<vmem>>, %arg5: memref<1x4x256xf32, #tpu.memory_space<vmem>>, %arg6: memref<1x4x256xf32, #tpu.memory_space<vmem>>) attributes {dimension_semantics = [#tpu.dimension_semantics<parallel>, #tpu.dimension_semantics<parallel>], iteration_bounds = array<i64: 2, 1>, scalar_prefetch = 0 : i64, scratch_operands = 0 : i64, tpu.core_type = #tpu.core_type<tc>, window_params = [{pipeline_mode = #tpu.pipeline_mode<synchronous>, transform_indices = @transform_0, window_bounds = array<i64: 4, 8>}, {pipeline_mode = #tpu.pipeline_mode<synchronous>, transform_indices = @transform_1, window_bounds = array<i64: 4, 1>}, {transform_indices = @transform_2, window_bounds = array<i64: 1, 8, 256>}, {transform_indices = @transform_3, window_bounds = array<i64: 1, 4, 256>}, {transform_indices = @transform_4, window_bounds = array<i64: 1, 4, 256>}]} {
    %c0 = arith.constant 0 : index
    %c0_0 = arith.constant 0 : index
    %0 = vector.load %arg2[%c0, %c0_0] : memref<4x8xf32, #tpu.memory_space<vmem>>, vector<4x8xf32>
    %c0_1 = arith.constant 0 : index
    %c0_2 = arith.constant 0 : index
    %c0_3 = arith.constant 0 : index
    %1 = vector.load %arg4[%c0_1, %c0_2, %c0_3] : memref<1x8x256xf32, #tpu.memory_space<vmem>>, vector<1x8x256xf32>
    %2 = vector.shape_cast %1 : vector<1x8x256xf32> to vector<8x256xf32>
    %cst = arith.constant dense<0.000000e+00> : vector<4x256xf32>
    %3 = tpu.matmul %0, %2, %cst {dimension_numbers = #tpu.dot_dimension_numbers<[1], [0], [0], [1], [0, 0, 1, 1], [], []>} : vector<4x8xf32>, vector<8x256xf32>, vector<4x256xf32> -> vector<4x256xf32>
    %c0_4 = arith.constant 0 : index
    %c0_5 = arith.constant 0 : index
    %c0_6 = arith.constant 0 : index
    %4 = vector.load %arg5[%c0_4, %c0_5, %c0_6] : memref<1x4x256xf32, #tpu.memory_space<vmem>>, vector<1x4x256xf32>
    %5 = vector.shape_cast %4 : vector<1x4x256xf32> to vector<4x256xf32>
    %6 = arith.addf %5, %3 : vector<4x256xf32>
    %c0_7 = arith.constant 0 : index
    %c0_8 = arith.constant 0 : index
    %7 = vector.load %arg3[%c0_7, %c0_8] : memref<4x1xf32, #tpu.memory_space<vmem>>, vector<4x1xf32>
    %8 = vector.broadcast %7 : vector<4x1xf32> to vector<4x256xf32>
    %9 = arith.addf %6, %8 : vector<4x256xf32>
    %c0_9 = arith.constant 0 : index
    %c0_10 = arith.constant 0 : index
    %c0_11 = arith.constant 0 : index
    %10 = vector.load %arg6[%c0_9, %c0_10, %c0_11] : memref<1x4x256xf32, #tpu.memory_space<vmem>>, vector<1x4x256xf32>
    %11 = vector.shape_cast %10 : vector<1x4x256xf32> to vector<4x256xf32>
    %12 = vector.shape_cast %9 : vector<4x256xf32> to vector<1x4x256xf32>
    tpu.vector_store %arg6[%c0_9, %c0_10, %c0_11], %12 {strides = array<i32>} : memref<1x4x256xf32, #tpu.memory_space<vmem>>, vector<1x4x256xf32>,
    return
  }
  func.func @transform_0(%arg0: i32, %arg1: i32) -> (i32, i32) {
    %c0_i32 = arith.constant 0 : i32
    %c0_i32_0 = arith.constant 0 : i32
    %c0_i32_1 = arith.constant 0 : i32
    return %c0_i32, %c0_i32_0 : i32, i32
  }
  func.func @transform_1(%arg0: i32, %arg1: i32) -> (i32, i32) {
    %c0_i32 = arith.constant 0 : i32
    %c0_i32_0 = arith.constant 0 : i32
    %c0_i32_1 = arith.constant 0 : i32
    return %c0_i32, %c0_i32_0 : i32, i32
  }
  func.func @transform_2(%arg0: i32, %arg1: i32) -> (i32, i32, i32) {
    %c0_i32 = arith.constant 0 : i32
    %c0_i32_0 = arith.constant 0 : i32
    return %arg0, %c0_i32, %arg1 : i32, i32, i32
  }
  func.func @transform_3(%arg0: i32, %arg1: i32) -> (i32, i32, i32) {
    %c0_i32 = arith.constant 0 : i32
    %c0_i32_0 = arith.constant 0 : i32
    return %arg0, %c0_i32, %arg1 : i32, i32, i32
  }
  func.func @transform_4(%arg0: i32, %arg1: i32) -> (i32, i32, i32) {
    %c0_i32 = arith.constant 0 : i32
    %c0_i32_0 = arith.constant 0 : i32
    return %arg0, %c0_i32, %arg1 : i32, i32, i32
  }
}

</mosaic_0001>

<bundles_post_ra>
// kernel: tpu_custom_call.1
= control target key start
LH: loop header
LB: loop body
LE: loop exit
PB: predicated region body
PF: predicated region fallthrough
CT: control target
= control target key end

     0   :  { %9 = vsyncpa [#allocation3], 0  ;;  %s944_s0 = inlined_call_operand.vmem [shape: f32[4,8], index: 0, kind: input, shape index: {}]   ;;  %s945_s1 = inlined_call_operand.vmem [shape: f32[4,1], index: 1, kind: input, shape index: {}]   ;;  %s946_s2 = inlined_call_operand.hbm [shape: f32[2,8,256], index: 2, kind: input, shape index: {}]   ;;  %s947_s3 = inlined_call_operand.hbm [shape: f32[2,4,256], index: 3, kind: input, shape index: {}]   ;;  %s948_s4 = inlined_call_operand.hbm [shape: f32[2,4,256], index: 4, kind: output, shape index: {}]  }
   0x1   :  { %11 = vsyncpa [#allocation3 + $0x1], 0 }
   0x2   :  { %12 = vsyncpa [#allocation6], 0 }
   0x3   :  { %14 = vsyncpa [#allocation6 + $0x1], 0 }
   0x4   :  { %15 = vsyncpa [#allocation4], 0 }
   0x5   :  { %17 = vsyncpa [#allocation4 + $0x1], 0  ;;  %s770_s15 = smov 0   ;;  %s772_s16 = smov 0  }
   0x6   :  { %s774_s17 = smov 0   ;;  %s776_s18 = smov 0  }
   0x7   :  { %s778_s19 = smov 0   ;;  %s780_s20 = smov 0  }
   0x8 LB: > { %s503_s21 = sadd.s32 4294967295, %s737_s20   ;;  %s504_s22 = sadd.s32 4294967294, %s737_s20   ;;  %s737_s20 = sphi %s780_s20, %s23_s20   ;;  %s733_s19 = sphi %s778_s19, %s960_s19   ;;  %s729_s18 = sphi %s776_s18, %s959_s18   ;;  %s725_s17 = sphi %s774_s17, %s958_s17   ;;  %s721_s16 = sphi %s772_s16, %s957_s16   ;;  %s717_s15 = sphi %s770_s15, %s956_s15  }
   0x9   : > { %s35_s23 = sadd.s32 1, %s733_s19  ;;  %s86_s24 = sadd.s32 1, %s725_s17 }
   0xa   : > { %p37_p0 = scmp.ge.s32.totalorder %s35_s23, 2  ;;  %p93_p1 = scmp.ne.s32.totalorder %s725_s17, %s721_s16 }
   0xb   : > { %p94_p2 = scmp.eq.s32.totalorder %s737_s20, 0  ;;  %p99_p3 = scmp.ne.s32.totalorder %s721_s16, %s717_s15 }
   0xc   : > { %s962_s23 = smov (%p37_p0, %s35_s23), 0  ;;  %p100_p5 = scmp.eq.s32.totalorder %s503_s21, 0 }
   0xd   : > { %p811_p4 = por %p94_p2, %p93_p1  ;;  %s81_s26 = ssub.s32 %s733_s19, %s962_s23 }
   0xe   : > { %p153_p6 = scmp.eq.s32.totalorder %s503_s21, 1  ;;  %p84_p7 = scmp.eq.s32.totalorder %s81_s26, 0 }
   0xf   : > { %p817_p8 = por %p100_p5, %p99_p3  ;;  %p159_p10 = scmp.eq.s32.totalorder %s504_s22, 1 }
  0x10   : > { %p821_p9 = por %p153_p6, %p93_p1  ;;  %p543_p13 = scmp.lt.s32.totalorder %s737_s20, 2 }
  0x11   : > { %s826_s29 = scalar_select %p84_p7, %s725_s17, %s86_s24  }
  0x12   : > { %p828_p11 = por %p159_p10, %p99_p3  ;;  %s835_s5 = sand.u32 1, %s725_s17  }
  0x13   : > { %s507_s6 = sshll.u32 %s835_s5, 4  ;;  %s523_s7 = sshll.u32 %s733_s19, 8 }
  0x14   : > { %s197_s10 = scalar_lea.hbm %s946_s2, %s523_s7  ;;  %s189_s11 = scalar_lea.vmem [#allocation2], %s507_s6 }
  0x15   : > { %s199_s12 = sshll.u32 %s189_s11, 4  ;;  %p844_p0 = pnand %p543_p13, %p811_p4  ;;  %s200_s12 = int_to_ptr.vmem [resolvable:$true] %s199_s12 }
  0x16   : > { %p513_p1 = scmp.ge.s32.totalorder %s737_s20, 1  ;;  %p225_p2 = scmp.lt.s32.totalorder %s737_s20, 3 }
  0x17   : > { %s186_s14 = scalar_lea.sflag [#allocation3], %s835_s5  ;;  %p599_p3 = pneg %p844_p0 }
  0x18   : > { %s610_s21 = scalar_lea.vmem %s200_s12, 256  ;;  %s739_s22 = smov [#allocation2]  }
  0x19   : > { %p611_p5 = scmp.ne.s32.totalorder %s200_s12, %s610_s21  ;;  %s615_s24 = sshll.u32 %s739_s22, 4  ;;  %s616_s24 = int_to_ptr.vmem [resolvable:$false] %s615_s24 }
  0x1a   : > { %s617_s25 = scalar_lea.vmem %s616_s24, 512  ;;  %p618_p4 = scmp.lt.s32.totalorder %s200_s12, %s616_s24 }
  0x1b   : > { %p613_p6 = pnand %p611_p5, %p599_p3  ;;  %p619_p10 = scmp.lt.s32.totalorder %s617_s25, %s610_s21 }
  0x1d   : > { %p614_p7 = pneg %p613_p6  ;;  %p620_p13 = por %p619_p10, %p618_p4 }
  0x1f   : > { %p621_p12 = pnand %p620_p13, %p614_p7 }
  0x21   : > { %624 = shalt.err (!%p621_p12)
}
  0x22   : > { %535 = dma.hbm_to_vmem [thread:$0]  (!%p844_p0), %s197_s10, 256, %s200_s12, %s186_s14  }
  0x23   : > { %p862_p5 = pnand %p513_p1, %p225_p2  ;;  %s510_s6 = sshll.u32 %s835_s5, 3 }
  0x24   : > { %s524_s7 = sshll.u32 %s733_s19, 7  ;;  %s210_s21 = scalar_lea.vmem [#allocation5], %s510_s6 }
  0x25   : > { %s218_s11 = scalar_lea.hbm %s947_s3, %s524_s7  ;;  %s220_s22 = sshll.u32 %s210_s21, 4  ;;  %s221_s22 = int_to_ptr.vmem [resolvable:$true] %s220_s22 }
  0x26   : > { %s207_s24 = scalar_lea.sflag [#allocation6], %s835_s5  ;;  %s638_s25 = scalar_lea.vmem %s221_s22, 128 }
  0x27   : > { %p639_p12 = scmp.ne.s32.totalorder %s221_s22, %s638_s25  ;;  %s740_s10 = smov [#allocation5]  }
  0x28   : > { %s643_s12 = sshll.u32 %s740_s10, 4  ;;  %s644_s12 = int_to_ptr.vmem [resolvable:$false] %s643_s12 }
  0x29   : > { %p641_p6 = pnand %p639_p12, %p599_p3  ;;  %s645_s14 = scalar_lea.vmem %s644_s12, 256 }
  0x2a   : > { %p646_p1 = scmp.lt.s32.totalorder %s221_s22, %s644_s12  ;;  %p647_p2 = scmp.lt.s32.totalorder %s645_s14, %s638_s25 }
  0x2b   : > { %p642_p7 = pneg %p641_p6 }
  0x2c   : > { %p648_p4 = por %p647_p2, %p646_p1 }
  0x2e   : > { %p649_p10 = pnand %p648_p4, %p642_p7 }
  0x30   : > { %652 = shalt.err (!%p649_p10)
}
  0x31   : > { %538 = dma.hbm_to_vmem [thread:$0]  (!%p844_p0), %s218_s11, 128, %s221_s22, %s207_s24  }
  0x32   : > { %229 = sbr.rel (%p862_p5) target bundleno = 277 (0x115), region = 36  ;;  %s880_s5 = sand.u32 (!%p862_p5), 1, %s721_s16  }
  0x33   : > { %s514_s6 = sshll.u32 (!%p862_p5), %s880_s5, 4  ;;  %s232_s7 = scalar_lea.sflag (!%p862_p5), [#allocation3], %s880_s5 }
  0x34   : > { %s235_s8 = scalar_lea.vmem (!%p862_p5), [#allocation2], %s514_s6 }
  0x37   : > { %704 = dma.done.wait (%p817_p8), %s232_s7, 256  }
  0x38   : > { %706 = vsyncadd (%p817_p8), %s232_s7, 4294967040  ;;  %s515_s13 = sshll.u32 %s880_s5, 3  ;;  %s241_s26 = scalar_lea.sflag [#allocation6], %s880_s5 }
  0x39   : > { %s244_s9 = scalar_lea.vmem [#allocation5], %s515_s13 }
  0x3a   : > { %708 = dma.done.wait (%p817_p8), %s241_s26, 128  }
  0x3b   : > { %710 = vsyncadd (%p817_p8), %s241_s26, 4294967168  ;;  %v741_v0 = vmov 0.0   ;;  %v742_v1 = vmov 0   ;;  %v279_v2 = vld [vmem:[%s235_s8 + $0x8] sm:$0xff]  ;;  %v278_v3 = vld [vmem:[%s235_s8] sm:$0xff]  ;;  %vm280_vm0 = vcmask 64512   ;;  %v369_v8 = vlaneseq }
  0x3c   : > { %348 = vmatprep.mubr.f32.mxu0 %v741_v0  ;;  %596 = vset.pattern.permute.xlu0 %v742_v1  ;;  %v277_v4 = vld [vmem:[%s944_s0] sm:$0xf]  ;;  %v743_v6 = vmov 839922192   ;;  %s525_s27 = sshll.u32 %s729_s18, 7  ;;  %s273_s25 = scalar_lea.vmem [#allocation7], %s515_s13 }
  0x3d   : > { %314 = vmatprep.subr.mxu0 %v279_v2  ;;  %v361_v5 = vld [vmem:[%s945_s1] sm:$0xf]  ;;  %v367_v7 = vunpack.c.l.s4 %v743_v6  ;;  %v370_v10 = vshrl.u32 %v369_v8, 7  ;;  %s393_s10 = sshll.u32 %s273_s25, 4  ;;  %s391_s6 = scalar_lea.hbm %s948_s4, %s525_s27  ;;  %s394_s10 = int_to_ptr.vmem [resolvable:$true] %s393_s10 }
  0x3e   : > { %315 = vmatpush1.msra.mxu0 %v278_v3  ;;  %364 = vperm.xlu0 %596, %v361_v5   ;;  %v355_v15 = vld [vmem:[%s244_s9] sm:$0xff]  ;;  %s377_s7 = scalar_lea.sflag [#allocation4], %s880_s5  ;;  %s653_s8 = scalar_lea.vmem %s394_s10, 128 }
  0x3f   : > { %517 = vmatmul.mubr.msk.f32.vlgmr.msra.gmra.mxu0 %vm280_vm0, %v277_v4  ;;  %v368_v9 = vunpack.c.0.s8 %v367_v7  ;;  %p654_p8 = scmp.ne.s32.totalorder %s394_s10, %s653_s8  ;;  %s744_s26 = smov [#allocation7]  }
  0x40   : > { %s657_s9 = sshll.u32 %s744_s26, 4  ;;  %s658_s9 = int_to_ptr.vmem [resolvable:$false] %s657_s9 }
  0x41   : > { %v371_v11 = vsub.s32 %v368_v9, %v370_v10  ;;  %p655_p0 = pnand %p654_p8, %p821_p9  ;;  %s659_s18 = scalar_lea.vmem %s658_s9, 256 }
  0x42   : > { %p660_p13 = scmp.lt.s32.totalorder %s394_s10, %s658_s9  ;;  %p661_p5 = scmp.lt.s32.totalorder %s659_s18, %s653_s8 }
  0x43   : > { %p656_p3 = pneg %p655_p0 }
  0x44   : > { %p662_p12 = por %p661_p5, %p660_p13 }
  0x46   : > { %p663_p6 = pnand %p662_p12, %p656_p3 }
  0xb9   : > { %v365_v13 = vpop.permute.xlu0 %364 }
  0xba   : > { %v372_v17 = vrot.slane %v365_v13, %v371_v11 }
  0xff   : > { %v350_v12 = vpop.f32.mrf.mxu0 }
 0x101   : > { %v352_v14 = vpop.f32.mrf.mxu0 }
 0x102   : > { %v358_v16 = vcombine.low %v350_v12, %v352_v14 }
 0x104   : > { %v360_v18 = vadd.f32 %v358_v16, %v355_v15 }
 0x106   : > { %v374_v19 = vadd.f32 %v372_v17, %v360_v18 }
 0x108   : > { %375 = vst [vmem:[%s273_s25] sm:$0xff] %v374_v19 }
 0x109   : > { %666 = shalt.err (!%p663_p6)
}
 0x10a   : > { %s667_s13 = scalar_lea.hbm %s391_s6, 128  ;;  %s671_s21 = scalar_lea.hbm %s948_s4, 256 }
 0x10b   : > { %p668_p7 = scmp.ne.s32.totalorder %s391_s6, %s667_s13  ;;  %p672_p4 = scmp.lt.s32.totalorder %s391_s6, %s948_s4 }
 0x10c   : > { %p673_p10 = scmp.lt.s32.totalorder %s671_s21, %s667_s13 }
 0x10d   : > { %p669_p1 = pnand %p668_p7, %p821_p9 }
 0x10e   : > { %p674_p8 = por %p673_p10, %p672_p4 }
 0x10f   : > { %p670_p2 = pneg %p669_p1 }
 0x111   : > { %p675_p0 = pnand %p674_p8, %p670_p2 }
 0x113   : > { %678 = shalt.err (!%p675_p0)
}
 0x114   : > { %530 = dma.vmem_to_hbm [thread:$0]  (%p821_p9), %s394_s10, 128, %s391_s6, %s377_s7  }
 0x115 PF: > { %s405_s27 = sand.u32 1, %s717_s15   ;;  %p955_p3 = scmp.ge.s32.totalorder %s737_s20, 2 }
 0x116   : > { %s406_s25 = scalar_lea.sflag [#allocation4], %s405_s27 }
 0x117   : > { %p540_p13 = pnand %p955_p3, %p828_p11 }
 0x119   : > { %p541_p5 = pneg %p540_p13 }
 0x11b   : > { %712 = dma.done.wait (%p541_p5), %s406_s25, 128  }
 0x11c   : > { %714 = vsyncadd (%p541_p5), %s406_s25, 4294967168  ;;  %s23_s20 = sadd.s32 1, %s737_s20   ;;  %s956_s15 = smov %s721_s16 }
 0x11d   : > { %p20_p12 = scmp.ge.s32.totalorder %s23_s20, 4   ;;  %s957_s16 = smov %s725_s17 }
 0x11e   : > { %s958_s17 = smov %s826_s29  ;;  %s959_s18 = smov %s733_s19 }
 0x11f   : > { %s960_s19 = smov %s962_s23  ;;  %22 = sbr.rel (!%p20_p12) target bundleno = 8 (0x8), region = 94 }
 0x124   :  { %411 = vsyncpa [#allocation3], 1 }
 0x125   :  { %413 = vsyncpa [#allocation3 + $0x1], 1 }
 0x126   :  { %414 = vsyncpa [#allocation6], 1 }
 0x127   :  { %416 = vsyncpa [#allocation6 + $0x1], 1 }
 0x128   :  { %417 = vsyncpa [#allocation4], 1 }
 0x129   :  { %419 = vsyncpa [#allocation4 + $0x1], 1 }

</bundles_post_ra>
